<compile_context>
chip_gen: v7x
topology: tpu7x:2x2x1
jax: 0.10.0
libtpu: 0.0.40
codegen_flags: <defaults>
</compile_context>

<pallas_src>
import math

import jax
import jax.numpy as jnp
from jax.experimental import pallas as pl
from jax.experimental.pallas import tpu as pltpu


TIMESTEPS = 100
PRED_TYPE = "pred_noise"   # cfg.pred_type


# ----------------------------------------------------------------------------
# Schedule (make_schedule_ddpm equivalent; only the buffers forward() touches)
# ----------------------------------------------------------------------------
def make_schedule_ddpm(timesteps, beta=(1e-4, 2e-2), beta_schedule="linear", s=0.008):
    assert beta[0] < beta[1] < 1.0
    if beta_schedule == "linear":
        betas = jnp.linspace(beta[0], beta[1], timesteps)
    elif beta_schedule == "cosine":
        x = jnp.linspace(0.0, timesteps, timesteps + 1)
        ac = jnp.cos((x / timesteps + s) / (1 + s) * math.pi * 0.5) ** 2
        ac = ac / ac[0]
        betas = jnp.clip(1.0 - ac[1:] / ac[:-1], 0.0, 0.999)
    elif beta_schedule == "sqrt":
        betas = jnp.sqrt(jnp.linspace(beta[0], beta[1], timesteps))
    else:
        raise Exception("Unsupported beta schedule.")
    betas = betas.astype(jnp.float32)
    alphas = 1.0 - betas
    alphas_cumprod = jnp.cumprod(alphas)
    return {
        "sqrt_alphas_cumprod": jnp.sqrt(alphas_cumprod).astype(jnp.float32),
        "sqrt_one_minus_alphas_cumprod": jnp.sqrt(1.0 - alphas_cumprod).astype(jnp.float32),
    }


def _round_up(x, m):
    return (x + m - 1) // m * m


def _gelu(x):
    # TODO(synk): tanh-approx GELU; the real eps_model is external to this module.
    c = math.sqrt(2.0 / math.pi)
    return 0.5 * x * (1.0 + jnp.tanh(c * (x + 0.044715 * x * x * x)))


# ----------------------------------------------------------------------------
# Pallas kernel: fused q_sample + eps_model MLP over one (batch, seq-tile) block
# ----------------------------------------------------------------------------
def ddpm_forward_kernel(ca_ref, cs_ref,          # SMEM (B,) f32 scalar-prefetch coefs
                        x_ref, nz_ref,           # (1, TS, D) f32
                        cond_ref,                # (1, 1, H)  f32 hoisted temb@wt + y@wy + b1
                        w1_ref, w2_ref,          # (D, H), (H, D) bf16 (resident)
                        b2_ref,                  # (1, D) f32
                        out_ref):                # (1, TS, D) f32
    b = pl.program_id(0)
    ca = ca_ref[b]                               # scalar f32 from SMEM
    cs = cs_ref[b]

    # q_sample: x_t = sqrt_ac[t]*x0 + sqrt_1m_ac[t]*noise   (f32 on the VPU)
    x_t = ca * x_ref[0] + cs * nz_ref[0]         # (TS, D)

    # eps_model: out = gelu(x_t@w1 + cond) @ w2 + b2   (bf16 MXU operands, f32 acc)
    h = jnp.dot(x_t.astype(jnp.bfloat16), w1_ref[...],
                preferred_element_type=jnp.float32)
    h = _gelu(h + cond_ref[0])                   # (TS, H) + (1, H) broadcast
    out = jnp.dot(h.astype(jnp.bfloat16), w2_ref[...],
                  preferred_element_type=jnp.float32)
    out_ref[0] = (out + b2_ref[...]).astype(out_ref.dtype)


# ----------------------------------------------------------------------------
# Wrapper: schedule gather, time embedding, cond hoist, tiling, pallas_call
# ----------------------------------------------------------------------------
def conditional_ddpm_forward(params, schedule, x0, y, ts, noise):
    B, S, D = x0.shape
    Dt, H = params["wt"].shape

    # per-batch q_sample coefficients (schedule gather: glue) -> SMEM scalar prefetch
    coef_a = schedule["sqrt_alphas_cumprod"][ts].astype(jnp.float32)             # (B,)
    coef_s = schedule["sqrt_one_minus_alphas_cumprod"][ts].astype(jnp.float32)   # (B,)

    # sinusoidal time embedding of ts (glue)
    half = Dt // 2
    freqs = jnp.exp(-math.log(10000.0) * jnp.arange(half, dtype=jnp.float32) / half)
    ang = ts.astype(jnp.float32)[:, None] * freqs[None, :]
    temb = jnp.concatenate([jnp.sin(ang), jnp.cos(ang)], axis=-1)                # (B, Dt)

    # Hoisted conditional bias: ONE (B, 1, H) array, indexed per batch (no repeat).
    cond = (temb @ params["wt"] + y @ params["wy"] + params["b1"]).astype(jnp.float32)
    cond = cond.reshape(B, 1, H)

    # ---- sequence tiling within each batch (no feature-dim padding in HBM) ----
    TS = min(512, _round_up(S, 8))
    Sp = _round_up(S, TS)
    if Sp != S:
        pad = ((0, 0), (0, Sp - S), (0, 0))
        x_in = jnp.pad(x0.astype(jnp.float32), pad)
        nz_in = jnp.pad(noise.astype(jnp.float32), pad)
    else:
        x_in = x0.astype(jnp.float32)
        nz_in = noise.astype(jnp.float32)

    w1 = params["w1"].astype(jnp.bfloat16)                                       # (D, H)
    w2 = params["w2"].astype(jnp.bfloat16)                                       # (H, D)
    b2 = params["b2"].astype(jnp.float32)                                        # (1, D)

    grid = (B, Sp // TS)

    # VMEM budget from the actual footprint (double-buffered row tiles + weights).
    tile_io = 3 * TS * D * 4                                   # x, noise, out tiles
    resident = 2 * (D * H * 2 + H * D * 2 + D * 4 + H * 4)     # w1, w2, b2, cond (dbl-buf)
    vmem_limit = int(min(32 << 20, max(4 << 20, 4 * (2 * tile_io + resident))))

    M = B * S
    cost = pl.CostEstimate(
        flops=4 * M * D * H + 4 * M * D + 10 * M * H,          # 2 matmuls + q_sample + gelu poly
        transcendentals=M * H,                                 # tanh in GELU
        bytes_accessed=(3 * M * D * 4                          # x, noise read + out write
                        + B * H * 4 + 2 * B * 4                # cond + coefs
                        + 2 * D * H * 2 + D * 4),              # weights + b2
    )

    out_pad = pl.pallas_call(
        ddpm_forward_kernel,
        out_shape=jax.ShapeDtypeStruct((B, Sp, D), jnp.float32),
        grid_spec=pltpu.PrefetchScalarGridSpec(
            num_scalar_prefetch=2,
            grid=grid,
            in_specs=[
                pl.BlockSpec((1, TS, D), lambda b, si, ca, cs: (b, si, 0)),  # x0
                pl.BlockSpec((1, TS, D), lambda b, si, ca, cs: (b, si, 0)),  # noise
                pl.BlockSpec((1, 1, H), lambda b, si, ca, cs: (b, 0, 0)),    # cond (per batch)
                pl.BlockSpec((D, H), lambda b, si, ca, cs: (0, 0)),          # w1 (resident)
                pl.BlockSpec((H, D), lambda b, si, ca, cs: (0, 0)),          # w2 (resident)
                pl.BlockSpec((1, D), lambda b, si, ca, cs: (0, 0)),          # b2 (resident)
            ],
            out_specs=pl.BlockSpec((1, TS, D), lambda b, si, ca, cs: (b, si, 0)),
        ),
        compiler_params=pltpu.CompilerParams(
            dimension_semantics=("parallel", "parallel"),
            vmem_limit_bytes=vmem_limit,
        ),
        cost_estimate=cost,
    )(coef_a, coef_s, x_in, nz_in, cond, w1, w2, b2)

    output = out_pad[:, :S, :]
    target = noise if PRED_TYPE == "pred_noise" else x0
    return target, output


# ----------------------------------------------------------------------------
# Pure-JAX f32 reference of the same forward (correctness check)
# ----------------------------------------------------------------------------
def reference_forward(params, schedule, x0, y, ts, noise):
    B, S, D = x0.shape
    a = schedule["sqrt_alphas_cumprod"][ts].reshape(B, 1, 1)
    s = schedule["sqrt_one_minus_alphas_cumprod"][ts].reshape(B, 1, 1)
    x_t = a * x0 + s * noise
    Dt = params["wt"].shape[0]
    half = Dt // 2
    freqs = jnp.exp(-math.log(10000.0) * jnp.arange(half, dtype=jnp.float32) / half)
    ang = ts.astype(jnp.float32)[:, None] * freqs[None, :]
    temb = jnp.concatenate([jnp.sin(ang), jnp.cos(ang)], axis=-1)
    h = (jnp.einsum("bsd,dh->bsh", x_t, params["w1"])
         + (temb @ params["wt"])[:, None, :]
         + (y @ params["wy"])[:, None, :]
         + params["b1"])
    h = _gelu(h)
    out = jnp.einsum("bsh,hd->bsd", h, params["w2"]) + params["b2"]
    target = noise if PRED_TYPE == "pred_noise" else x0
    return target, out


if __name__ == "__main__":
    B, S, D = 2, 8, 32          # batch, frames, feature dim
    H, Dt, C = 64, 32, 32       # eps_model hidden, time-emb dim, condition dim

    key = jax.random.PRNGKey(0)
    kx, ky, kts, knz, kw = jax.random.split(key, 5)

    x = jax.random.normal(kx, (B, S, D), dtype=jnp.float32)       # data['x']
    y = jax.random.normal(ky, (B, C), dtype=jnp.float32)          # data['y'] condition
    ts = jax.random.randint(kts, (B,), 0, TIMESTEPS)              # rand_ts_noise: ts
    noise = jax.random.normal(knz, (B, S, D), dtype=jnp.float32)  # rand_ts_noise: noise

    # deterministic synthetic eps_model parameters
    # TODO(synk): the real eps_model architecture is external to this module; a
    # small conditional MLP stands in for it here.
    k1, k2, k3, k4 = jax.random.split(kw, 4)
    params = {
        "w1": 0.05 * jax.random.normal(k1, (D, H), dtype=jnp.float32),
        "wt": 0.05 * jax.random.normal(k2, (Dt, H), dtype=jnp.float32),
        "wy": 0.05 * jax.random.normal(k3, (C, H), dtype=jnp.float32),
        "b1": jnp.zeros((1, H), dtype=jnp.float32),
        "w2": 0.05 * jax.random.normal(k4, (H, D), dtype=jnp.float32),
        "b2": jnp.zeros((1, D), dtype=jnp.float32),
    }

    schedule = make_schedule_ddpm(TIMESTEPS, beta=(1e-4, 2e-2), beta_schedule="linear")

    target, output = conditional_ddpm_forward(params, schedule, x, y, ts, noise)
    target = jax.block_until_ready(target)
    output = jax.block_until_ready(output)

    ref_target, ref_output = reference_forward(params, schedule, x, y, ts, noise)
    assert target.shape == (B, S, D) and output.shape == (B, S, D)
    assert jnp.allclose(target, ref_target, atol=1e-5, rtol=1e-5)
    # Kernel uses bf16 MXU operands (f32 accumulation); reference is pure f32.
    assert jnp.allclose(output, ref_output, atol=2e-2, rtol=2e-2)

    print("KERNEL_OK")
</pallas_src>

<mosaic_0001>
module attributes {stable_mosaic.version = 11 : i64} {
  func.func @ddpm_forward_kernel(%arg0: i32, %arg1: i32, %arg2: memref<2xf32, #tpu.memory_space<smem>>, %arg3: memref<2xf32, #tpu.memory_space<smem>>, %arg4: memref<1x8x32xf32, #tpu.memory_space<vmem>>, %arg5: memref<1x8x32xf32, #tpu.memory_space<vmem>>, %arg6: memref<1x1x64xf32, #tpu.memory_space<vmem>>, %arg7: memref<32x64xbf16, #tpu.memory_space<vmem>>, %arg8: memref<64x32xbf16, #tpu.memory_space<vmem>>, %arg9: memref<1x32xf32, #tpu.memory_space<vmem>>, %arg10: memref<1x8x32xf32, #tpu.memory_space<vmem>>) attributes {dimension_semantics = [#tpu.dimension_semantics<parallel>, #tpu.dimension_semantics<parallel>], iteration_bounds = array<i64: 2, 1>, scalar_prefetch = 2 : i64, scratch_operands = 0 : i64, tpu.core_type = #tpu.core_type<tc>, window_params = [{transform_indices = @transform_0, window_bounds = array<i64: 1, 8, 32>}, {transform_indices = @transform_1, window_bounds = array<i64: 1, 8, 32>}, {transform_indices = @transform_2, window_bounds = array<i64: 1, 1, 64>}, {pipeline_mode = #tpu.pipeline_mode<synchronous>, transform_indices = @transform_3, window_bounds = array<i64: 32, 64>}, {pipeline_mode = #tpu.pipeline_mode<synchronous>, transform_indices = @transform_4, window_bounds = array<i64: 64, 32>}, {pipeline_mode = #tpu.pipeline_mode<synchronous>, transform_indices = @transform_5, window_bounds = array<i64: 1, 32>}, {transform_indices = @transform_6, window_bounds = array<i64: 1, 8, 32>}]} {
    %0 = arith.index_cast %arg0 : i32 to index
    %1 = memref.load %arg2[%0] : memref<2xf32, #tpu.memory_space<smem>>
    %2 = arith.index_cast %arg0 : i32 to index
    %3 = memref.load %arg3[%2] : memref<2xf32, #tpu.memory_space<smem>>
    %c0 = arith.constant 0 : index
    %c0_0 = arith.constant 0 : index
    %c0_1 = arith.constant 0 : index
    %4 = vector.load %arg4[%c0, %c0_0, %c0_1] : memref<1x8x32xf32, #tpu.memory_space<vmem>>, vector<1x8x32xf32>
    %5 = vector.shape_cast %4 : vector<1x8x32xf32> to vector<8x32xf32>
    %6 = vector.broadcast %1 : f32 to vector<8x32xf32>
    %7 = arith.mulf %6, %5 : vector<8x32xf32>
    %c0_2 = arith.constant 0 : index
    %c0_3 = arith.constant 0 : index
    %c0_4 = arith.constant 0 : index
    %8 = vector.load %arg5[%c0_2, %c0_3, %c0_4] : memref<1x8x32xf32, #tpu.memory_space<vmem>>, vector<1x8x32xf32>
    %9 = vector.shape_cast %8 : vector<1x8x32xf32> to vector<8x32xf32>
    %10 = vector.broadcast %3 : f32 to vector<8x32xf32>
    %11 = arith.mulf %10, %9 : vector<8x32xf32>
    %12 = arith.addf %7, %11 : vector<8x32xf32>
    %13 = arith.truncf %12 : vector<8x32xf32> to vector<8x32xbf16>
    %c0_5 = arith.constant 0 : index
    %c0_6 = arith.constant 0 : index
    %14 = vector.load %arg7[%c0_5, %c0_6] : memref<32x64xbf16, #tpu.memory_space<vmem>>, vector<32x64xbf16>
    %cst = arith.constant dense<0.000000e+00> : vector<8x64xf32>
    %15 = tpu.matmul %13, %14, %cst {dimension_numbers = #tpu.dot_dimension_numbers<[1], [0], [0], [1], [0, 0, 1, 1], [], []>} : vector<8x32xbf16>, vector<32x64xbf16>, vector<8x64xf32> -> vector<8x64xf32>
    %c0_7 = arith.constant 0 : index
    %c0_8 = arith.constant 0 : index
    %c0_9 = arith.constant 0 : index
    %16 = vector.load %arg6[%c0_7, %c0_8, %c0_9] : memref<1x1x64xf32, #tpu.memory_space<vmem>>, vector<1x1x64xf32>
    %17 = vector.shape_cast %16 : vector<1x1x64xf32> to vector<1x64xf32>
    %18 = vector.broadcast %17 : vector<1x64xf32> to vector<8x64xf32>
    %19 = arith.addf %15, %18 : vector<8x64xf32>
    %cst_10 = arith.constant 5.000000e-01 : f32
    %20 = vector.broadcast %cst_10 : f32 to vector<8x64xf32>
    %21 = arith.mulf %20, %19 : vector<8x64xf32>
    %cst_11 = arith.constant 4.471500e-02 : f32
    %22 = vector.broadcast %cst_11 : f32 to vector<8x64xf32>
    %23 = arith.mulf %22, %19 : vector<8x64xf32>
    %24 = arith.mulf %23, %19 : vector<8x64xf32>
    %25 = arith.mulf %24, %19 : vector<8x64xf32>
    %26 = arith.addf %19, %25 : vector<8x64xf32>
    %cst_12 = arith.constant 0.797884583 : f32
    %27 = vector.broadcast %cst_12 : f32 to vector<8x64xf32>
    %28 = arith.mulf %27, %26 : vector<8x64xf32>
    %29 = math.tanh %28 : vector<8x64xf32>
    %cst_13 = arith.constant 1.000000e+00 : f32
    %30 = vector.broadcast %cst_13 : f32 to vector<8x64xf32>
    %31 = arith.addf %30, %29 : vector<8x64xf32>
    %32 = arith.mulf %21, %31 : vector<8x64xf32>
    %33 = arith.truncf %32 : vector<8x64xf32> to vector<8x64xbf16>
    %c0_14 = arith.constant 0 : index
    %c0_15 = arith.constant 0 : index
    %34 = vector.load %arg8[%c0_14, %c0_15] : memref<64x32xbf16, #tpu.memory_space<vmem>>, vector<64x32xbf16>
    %cst_16 = arith.constant dense<0.000000e+00> : vector<8x32xf32>
    %35 = tpu.matmul %33, %34, %cst_16 {dimension_numbers = #tpu.dot_dimension_numbers<[1], [0], [0], [1], [0, 0, 1, 1], [], []>} : vector<8x64xbf16>, vector<64x32xbf16>, vector<8x32xf32> -> vector<8x32xf32>
    %c0_17 = arith.constant 0 : index
    %c0_18 = arith.constant 0 : index
    %36 = vector.load %arg9[%c0_17, %c0_18] : memref<1x32xf32, #tpu.memory_space<vmem>>, vector<1x32xf32>
    %37 = vector.broadcast %36 : vector<1x32xf32> to vector<8x32xf32>
    %38 = arith.addf %35, %37 : vector<8x32xf32>
    %c0_19 = arith.constant 0 : index
    %c0_20 = arith.constant 0 : index
    %c0_21 = arith.constant 0 : index
    %39 = vector.load %arg10[%c0_19, %c0_20, %c0_21] : memref<1x8x32xf32, #tpu.memory_space<vmem>>, vector<1x8x32xf32>
    %40 = vector.shape_cast %39 : vector<1x8x32xf32> to vector<8x32xf32>
    %41 = vector.shape_cast %38 : vector<8x32xf32> to vector<1x8x32xf32>
    tpu.vector_store %arg10[%c0_19, %c0_20, %c0_21], %41 {strides = array<i32>} : memref<1x8x32xf32, #tpu.memory_space<vmem>>, vector<1x8x32xf32>,
    return
  }
  func.func @transform_0(%arg0: i32, %arg1: i32, %arg2: memref<2xf32, #tpu.memory_space<smem>>, %arg3: memref<2xf32, #tpu.memory_space<smem>>) -> (i32, i32, i32) {
    %c0_i32 = arith.constant 0 : i32
    %c0_i32_0 = arith.constant 0 : i32
    return %arg0, %arg1, %c0_i32 : i32, i32, i32
  }
  func.func @transform_1(%arg0: i32, %arg1: i32, %arg2: memref<2xf32, #tpu.memory_space<smem>>, %arg3: memref<2xf32, #tpu.memory_space<smem>>) -> (i32, i32, i32) {
    %c0_i32 = arith.constant 0 : i32
    %c0_i32_0 = arith.constant 0 : i32
    return %arg0, %arg1, %c0_i32 : i32, i32, i32
  }
  func.func @transform_2(%arg0: i32, %arg1: i32, %arg2: memref<2xf32, #tpu.memory_space<smem>>, %arg3: memref<2xf32, #tpu.memory_space<smem>>) -> (i32, i32, i32) {
    %c0_i32 = arith.constant 0 : i32
    %c0_i32_0 = arith.constant 0 : i32
    %c0_i32_1 = arith.constant 0 : i32
    return %arg0, %c0_i32, %c0_i32_0 : i32, i32, i32
  }
  func.func @transform_3(%arg0: i32, %arg1: i32, %arg2: memref<2xf32, #tpu.memory_space<smem>>, %arg3: memref<2xf32, #tpu.memory_space<smem>>) -> (i32, i32) {
    %c0_i32 = arith.constant 0 : i32
    %c0_i32_0 = arith.constant 0 : i32
    %c0_i32_1 = arith.constant 0 : i32
    return %c0_i32, %c0_i32_0 : i32, i32
  }
  func.func @transform_4(%arg0: i32, %arg1: i32, %arg2: memref<2xf32, #tpu.memory_space<smem>>, %arg3: memref<2xf32, #tpu.memory_space<smem>>) -> (i32, i32) {
    %c0_i32 = arith.constant 0 : i32
    %c0_i32_0 = arith.constant 0 : i32
    %c0_i32_1 = arith.constant 0 : i32
    return %c0_i32, %c0_i32_0 : i32, i32
  }
  func.func @transform_5(%arg0: i32, %arg1: i32, %arg2: memref<2xf32, #tpu.memory_space<smem>>, %arg3: memref<2xf32, #tpu.memory_space<smem>>) -> (i32, i32) {
    %c0_i32 = arith.constant 0 : i32
    %c0_i32_0 = arith.constant 0 : i32
    %c0_i32_1 = arith.constant 0 : i32
    return %c0_i32, %c0_i32_0 : i32, i32
  }
  func.func @transform_6(%arg0: i32, %arg1: i32, %arg2: memref<2xf32, #tpu.memory_space<smem>>, %arg3: memref<2xf32, #tpu.memory_space<smem>>) -> (i32, i32, i32) {
    %c0_i32 = arith.constant 0 : i32
    %c0_i32_0 = arith.constant 0 : i32
    return %arg0, %arg1, %c0_i32 : i32, i32, i32
  }
}

</mosaic_0001>

<bundles_post_ra>
// kernel: tpu_custom_call.1
= control target key start
LH: loop header
LB: loop body
LE: loop exit
PB: predicated region body
PF: predicated region fallthrough
CT: control target
= control target key end

     0   :  { %s1035_s0 = inlined_call_operand.hbm [shape: f32[2], index: 0, kind: input, shape index: {}]   ;;  %s1036_s2 = inlined_call_operand.vmem [shape: f32[2,8,32], index: 2, kind: input, shape index: {}]   ;;  %s1037_s3 = inlined_call_operand.vmem [shape: f32[2,8,32], index: 3, kind: input, shape index: {}]   ;;  %s1038_s4 = inlined_call_operand.vmem [shape: f32[2,1,64], index: 4, kind: input, shape index: {}]   ;;  %s1039_s5 = inlined_call_operand.vmem [shape: bf16[32,64], index: 5, kind: input, shape index: {}]   ;;  %s1040_s6 = inlined_call_operand.vmem [shape: bf16[64,32], index: 6, kind: input, shape index: {}]   ;;  %s1041_s7 = inlined_call_operand.vmem [shape: f32[1,32], index: 7, kind: input, shape index: {}]   ;;  %s1042_s8 = inlined_call_operand.hbm [shape: f32[2,8,32], index: 8, kind: output, shape index: {}]   ;;  %s1043_s1 = inlined_call_operand.vmem [shape: f32[2], index: 1, kind: input, shape index: {}]  }
   0x1   :  { %s723_s29 = scalar_lea.hbm %s1035_s0, 16 }
   0x2   :  { %p724_p0 = scmp.ne.s32.totalorder %s1035_s0, %s723_s29  ;;  %p727_p1 = scmp.lt.u32.totalorder %s723_s29, %s1035_s0 }
   0x4   :  { %p729_p2 = pnand %p727_p1, %p724_p0 }
   0x6   :  { %732 = shalt.err (!%p729_p2)  }
   0x7   :  { %s827_s12 = smov [#allocation3]   ;;  %s15_s17 = sshll.u32 %s1043_s1, 4  ;;  %s16_s17 = int_to_ptr.vmem [resolvable:$true] %s15_s17 }
   0x8   :  { %14 = dma.hbm_to_smem %s1035_s0, 16, %s827_s12, [#allocation2] }
   0x9   :  { %s733_s18 = scalar_lea.vmem %s16_s17, 16  ;;  %p738_p4 = scmp.lt.s32.totalorder %s16_s17, %s16_s17 }
   0xa   :  { %p734_p3 = scmp.ne.s32.totalorder %s16_s17, %s733_s18  ;;  %p739_p5 = scmp.lt.s32.totalorder %s733_s18, %s733_s18 }
   0xc   :  { %p740_p6 = por %p739_p5, %p738_p4 }
   0xe   :  { %p741_p7 = pnand %p740_p6, %p734_p3 }
  0x10   :  { %744 = shalt.err (!%p741_p7)  }
  0x11   :  { %s828_s19 = smov [#allocation4]  }
  0x12   :  { %18 = dma.vmem_to_smem %s16_s17, 16, %s828_s19, [#allocation2] }
  0x13   :  { %797 = dma.done.wait [#allocation2], 32 }
  0x14   :  { %798 = vsyncadd [#allocation2], 4294967264 }
  0x15   :  { %20 = sfence }
  0x16   :  { %21 = vsyncpa [#allocation6], 0 }
  0x17   :  { %23 = vsyncpa [#allocation6 + $0x1], 0  ;;  %s892_s0 = smov 0   ;;  %s894_s20 = smov 0  }
  0x18   :  { %s896_s1 = smov 0   ;;  %s898_s21 = smov 0  }
  0x19   :  { %s900_s22 = smov 0   ;;  %s902_s23 = smov 0  }
  0x1a LB: > { %s606_s24 = sadd.s32 4294967295, %s825_s23   ;;  %s607_s25 = sadd.s32 4294967294, %s825_s23   ;;  %s825_s23 = sphi %s902_s23, %s29_s23   ;;  %s821_s22 = sphi %s900_s22, %s1050_s22   ;;  %s817_s21 = sphi %s898_s21, %s1049_s21   ;;  %s813_s1 = sphi %s896_s1, %s1048_s1   ;;  %s809_s20 = sphi %s894_s20, %s1047_s20   ;;  %s805_s0 = sphi %s892_s0, %s1046_s0  }
  0x1b   : > { %s41_s26 = sadd.s32 1, %s821_s22  ;;  %s195_s27 = sadd.s32 1, %s813_s1 }
  0x1c   : > { %p43_p8 = scmp.ge.s32.totalorder %s41_s26, 2  ;;  %p205_p9 = scmp.ne.s32.totalorder %s813_s1, %s809_s20 }
  0x1d   : > { %p206_p10 = scmp.eq.s32.totalorder %s606_s24, 1  ;;  %p211_p11 = scmp.ne.s32.totalorder %s809_s20, %s805_s0 }
  0x1e   : > { %s1052_s26 = smov (%p43_p8, %s41_s26), 0  ;;  %p212_p13 = scmp.eq.s32.totalorder %s607_s25, 1 }
  0x1f   : > { %p932_p12 = por %p206_p10, %p205_p9  ;;  %s190_s29 = ssub.s32 %s821_s22, %s1052_s26 }
  0x20   : > { %p610_p0 = scmp.ge.s32.totalorder %s825_s23, 1  ;;  %p193_p1 = scmp.eq.s32.totalorder %s190_s29, 0 }
  0x21   : > { %p939_p2 = por %p212_p13, %p211_p11  ;;  %p265_p3 = scmp.lt.s32.totalorder %s825_s23, 3 }
  0x22   : > { %s945_s9 = scalar_select %p193_p1, %s813_s1, %s195_s27  }
  0x23   : > { %p266_p4 = pnand %p610_p0, %p265_p3 }
  0x24   : > { %v715_v0 = vld [vmem:[%s1039_s5] sm:$0xff] (!%p266_p4)   ;;  %v829_v1 = vmov (!%p266_p4), 0.0   ;;  %v716_v2 = vld [vmem:[%s1039_s5 + $0x8] sm:$0xff] (!%p266_p4)   ;;  %vm830_vm0 = vmmov (!%p266_p4), 0   ;;  %p307_p5 = scmp.lt.s32.totalorder (!%p266_p4), %s817_s21, 1  ;;  %s325_s14 = sld [smem:[#allocation3 + %s817_s21]] (!%p266_p4) }
  0x25   : > { %269 = sbr.rel (%p266_p4) target bundleno = 525 (0x20d), region = 44  ;;  %636 = vmatprep.subr.bf16.mxu0 (!%p266_p4), %v829_v1  ;;  %644 = vmatprep.subr.bf16.mxu1 (!%p266_p4), %v829_v1  ;;  %s326_s15 = sld [smem:[#allocation4 + %s817_s21]] (!%p266_p4)  ;;  %vm358_vm1 = vcmask (!%p266_p4), 261120   ;;  %v717_v11 = vld [vmem:[%s1040_s6] sm:$0xff] (!%p266_p4)   ;;  %v718_v12 = vld [vmem:[%s1040_s6 + $0x8] sm:$0xff] (!%p266_p4)   ;;  %v719_v13 = vld [vmem:[%s1040_s6 + $0x10] sm:$0xff] (!%p266_p4)  }
  0x26   : > { %637 = vmatpush3.bf16.msra.mxu0 (!%p266_p4), %v715_v0  ;;  %640 = vmatprep.mubr.msk.bf16.mxu0 (!%p266_p4), %vm830_vm0, %v829_v1  ;;  %v720_v14 = vld [vmem:[%s1040_s6 + $0x18] sm:$0xff] (!%p266_p4)   ;;  %vm451_vm2 = vcmask (!%p266_p4), 523264   ;;  %v618_v31 = vld [vmem:[%s1041_s7] ss:$0 sm:$0xff] (!%p266_p4)  ;;  %s625_s11 = sshll.u32 (!%p266_p4), %s817_s21, 7  ;;  %s831_s19 = smov (!%p266_p4), [#allocation5]  }
  0x27   : > { %638 = vmatprep.subr.bf16.mxu0 (!%p266_p4), %v829_v1  ;;  %652 = vmatprep.mubr.msk.bf16.mxu1 (!%p266_p4), %vm830_vm0, %v829_v1 }
  0x28   : > { %645 = vmatpush3.bf16.msra.mxu1 (!%p266_p4), %v717_v11 }
  0x29   : > { %646 = vmatprep.subr.bf16.mxu1 (!%p266_p4), %v829_v1 }
  0x2a   : > { %639 = vmatpush3.bf16.msra.mxu0 (!%p266_p4), %v716_v2  ;;  %v328_v4 = vstv (!%p266_p4), %s325_s14 }
  0x2b   : > { %v331_v7 = vstv (!%p266_p4), %s326_s15  ;;  %s987_s15 = scalar_lea.hbm (!%p266_p4), %s1042_s8, %s625_s11 }
  0x2c   : > { %s308_s16 = scalar_select %p307_p5, %s817_s21, 1  ;;  %647 = vmatpush3.bf16.msra.mxu1 %v718_v12 }
  0x2d   : > { %648 = vmatprep.subr.bf16.mxu1 %v829_v1 }
  0x2e   : > { %s612_s17 = sshll.u32 %s308_s16, 3  ;;  %s323_s25 = scalar_lea.vmem %s1038_s4, %s308_s16 }
  0x2f   : > { %s313_s24 = scalar_lea.vmem %s1036_s2, %s612_s17  ;;  %s320_s29 = scalar_lea.vmem %s1037_s3, %s612_s17  ;;  %v614_v15 = vld [vmem:[%s323_s25] ss:$0 sm:$0xff] }
  0x30   : > { %v327_v3 = vld [vmem:[%s313_s24] sm:$0xff]  ;;  %649 = vmatpush3.bf16.msra.mxu1 %v719_v13  ;;  %s304_s16 = sand.u32 1, %s809_s20   ;;  %s749_s24 = sshll.u32 %s831_s19, 4  ;;  %s750_s24 = int_to_ptr.vmem [resolvable:$false] %s749_s24 }
  0x31   : > { %v330_v5 = vld [vmem:[%s320_s29] sm:$0xff]  ;;  %v329_v6 = vmul.f32 %v328_v4, %v327_v3  ;;  %650 = vmatprep.subr.bf16.mxu1 %v829_v1  ;;  %s611_s27 = sshll.u32 %s304_s16, 3  ;;  %s497_s21 = scalar_lea.sflag [#allocation6], %s304_s16 }
  0x32   : > { %v332_v8 = vmul.f32 %v331_v7, %v330_v5  ;;  %s306_s12 = scalar_lea.vmem [#allocation5], %s611_s27  ;;  %s751_s25 = scalar_lea.vmem %s750_s24, 256 }
  0x33   : > { %s511_s13 = sshll.u32 %s306_s12, 4  ;;  %s989_s13 = int_to_ptr.vmem [resolvable:$true] %s511_s13 }
  0x34   : > { %v333_v9 = vadd.f32 %v332_v8, %v329_v6  ;;  %651 = vmatpush3.bf16.msra.mxu1 %v720_v14  ;;  %s745_s18 = scalar_lea.vmem %s989_s13, 128  ;;  %p752_p9 = scmp.lt.s32.totalorder %s989_s13, %s750_s24 }
  0x35   : > { %p746_p6 = scmp.ne.s32.totalorder %s989_s13, %s745_s18  ;;  %p753_p10 = scmp.lt.s32.totalorder %s751_s25, %s745_s18 }
  0x36   : > { %v334_v10 = vpack.c.bf16 %v333_v9, %v333_v9 }
  0x37   : > { %p747_p7 = pnand %p746_p6, %p932_p12  ;;  %p754_p11 = por %p753_p10, %p752_p9 }
  0x38   : > { %641 = vmatmul.mubr.msk.bf16.vlgmr.msra.gmra.mrb[0].mxu0 %vm358_vm1, %v334_v10 }
  0x39   : > { %p748_p8 = pneg %p747_p7 }
  0x3b   : > { %p755_p13 = pnand %p754_p11, %p748_p8 }
 0x10b   : > { %v396_v16 = vpop.f32.mrb[0].mxu0 }
 0x10c   : > { %v397_v17 = vadd.f32 %v614_v15, %v396_v16  ;;  %v642_v18 = vpop.f32.mrb[1].mxu0 }
 0x10d   : > { %v399_v19 = vpop.f32.mrb[2].mxu0 }
 0x10e   : > { %v403_v20 = vmul.f32 0.044715, %v397_v17  ;;  %v643_v21 = vpop.f32.mrb[3].mxu0  ;;  %v402_v27 = vmul.f32 0.5, %v397_v17 }
 0x110   : > { %v404_v22 = vmul.f32 %v403_v20, %v397_v17 }
 0x112   : > { %v405_v23 = vmul.f32 %v404_v22, %v397_v17 }
 0x114   : > { %v406_v24 = vadd.f32 %v405_v23, %v397_v17 }
 0x116   : > { %v407_v25 = vmul.f32 0.7978846, %v406_v24 }
 0x118   : > { %721 = vtanh.f32 %v407_v25 }
 0x122   : > { %v722_v26 = vpop.eup %721 }
 0x123   : > { %v409_v28 = vadd.f32 1.0, %v722_v26 }
 0x125   : > { %v410_v29 = vmul.f32 %v409_v28, %v402_v27 }
 0x127   : > { %v411_v30 = vpack.c.bf16 %v410_v29, %v410_v29 }
 0x129   : > { %653 = vmatmul.mubr.msk.bf16.vlgmr.msra.gmra.mrb[0].mxu1 %vm451_vm2, %v411_v30 }
 0x1fc   : > { %v489_v32 = vpop.f32.mrb[0].mxu1 }
 0x1fd   : > { %v490_v33 = vadd.f32 %v618_v31, %v489_v32  ;;  %v654_v34 = vpop.f32.mrb[1].mxu1 }
 0x1fe   : > { %v492_v35 = vpop.f32.mrb[2].mxu1 }
 0x1ff   : > { %v655_v36 = vpop.f32.mrb[3].mxu1  ;;  %495 = vst.msk [vmem:[%s306_s12] sm:$0xff] %vm358_vm1, %v490_v33 }
 0x200   : > { %758 = shalt.err (!%p755_p13)
}
 0x201   : > { %s759_s16 = scalar_lea.hbm %s987_s15, 128  ;;  %s763_s10 = scalar_lea.hbm %s1042_s8, 256 }
 0x202   : > { %p760_p0 = scmp.ne.s32.totalorder %s987_s15, %s759_s16  ;;  %p764_p4 = scmp.lt.u32.totalorder %s987_s15, %s1042_s8 }
 0x203   : > { %p765_p5 = scmp.lt.u32.totalorder %s763_s10, %s759_s16  ;;  %p767_p7 = scmp.lt.u32.totalorder %s759_s16, %s987_s15 }
 0x204   : > { %p761_p1 = pnand %p760_p0, %p932_p12 }
 0x205   : > { %p766_p6 = por %p765_p5, %p764_p4 }
 0x206   : > { %p762_p3 = pneg %p761_p1 }
 0x207   : > { %p768_p8 = por %p767_p7, %p766_p6 }
 0x209   : > { %p769_p9 = pnand %p768_p8, %p762_p3 }
 0x20b   : > { %772 = shalt.err (!%p769_p9)
}
 0x20c   : > { %656 = dma.vmem_to_hbm [thread:$0]  (%p932_p12), %s989_s13, 128, %s987_s15, %s497_s21  }
 0x20d PF: > { %p662_p10 = scmp.ge.s32.totalorder %s825_s23, 2  ;;  %s523_s14 = sand.u32 1, %s805_s0  }
 0x20e   : > { %s524_s17 = scalar_lea.sflag [#allocation6], %s523_s14 }
 0x20f   : > { %p659_p11 = pnand %p662_p10, %p939_p2 }
 0x211   : > { %800 = dma.done.wait (!%p659_p11), %s524_s17, 128  }
 0x212   : > { %802 = vsyncadd (!%p659_p11), %s524_s17, 4294967168  ;;  %s29_s23 = sadd.s32 1, %s825_s23   ;;  %s1046_s0 = smov %s809_s20 }
 0x213   : > { %p26_p13 = scmp.ge.s32.totalorder %s29_s23, 4   ;;  %s1047_s20 = smov %s813_s1 }
 0x214   : > { %s1048_s1 = smov %s945_s9  ;;  %s1049_s21 = smov %s821_s22 }
 0x215   : > { %s1050_s22 = smov %s1052_s26  ;;  %28 = sbr.rel (!%p26_p13) target bundleno = 26 (0x1a), region = 85 }
 0x21c   :  { %529 = vsyncpa [#allocation6], 1 }
 0x21d   :  { %531 = vsyncpa [#allocation6 + $0x1], 1 }

</bundles_post_ra>
